<compile_context>
chip_gen: v5e
topology: v5e:2x2
jax: 0.10.0
libtpu: 0.0.40
codegen_flags: <defaults>
</compile_context>

<pallas_src>
import jax
import jax.numpy as jnp
from jax.experimental import pallas as pl
from jax.experimental.pallas import tpu as pltpu

FEATURES = 1024
BN_EPS = 1e-5


def _bn_relu_kernel(x_ref, p_ref, o_ref):
    # x_ref: (tile_n, tile_f) activations; p_ref: (2, tile_f) [scale; shift]
    # (f32, resident across the batch grid axis).
    x = x_ref[...].astype(jnp.float32)
    scale = p_ref[0:1, :]                       # (1, tile_f) broadcasts over rows
    shift = p_ref[1:2, :]
    o_ref[...] = jnp.maximum(x * scale + shift, 0.0).astype(o_ref.dtype)


def linear_features_forward(x_nchw, gamma, beta, running_mean, running_var,
                            *, max_tile_n=2048):
    """Forward of LinearFeatures. x_nchw: (N, C, H, W) with C*H*W == 1024."""
    n = x_nchw.shape[0]
    x_flat = x_nchw.reshape(n, -1)              # Flatten(1024), native dtype
    assert x_flat.shape[1] == FEATURES, x_flat.shape

    # Fold BN (eval mode) into a single (2, F) scale/shift buffer (f32).
    scale = gamma.astype(jnp.float32) * jax.lax.rsqrt(
        running_var.astype(jnp.float32) + BN_EPS)
    shift = beta.astype(jnp.float32) - running_mean.astype(jnp.float32) * scale
    params = jnp.stack([scale, shift], axis=0)  # (2, 1024) f32

    # Tiling:
    #   * small N: one full-batch row block, feature axis split in 2 (v7x megacore)
    #   * large N: 2048-row (multiple-of-8) blocks, cdiv grid, ragged tail masked
    if n <= max_tile_n:
        tile_n = n                              # block dim == array dim -> no (8,128) rule
        grid_f = 2                              # 2 x 512-lane blocks -> both TCs busy on v7x
    else:
        tile_n = max_tile_n                     # multiple of 8
        grid_f = 1
    tile_f = FEATURES // grid_f
    grid = (pl.cdiv(n, tile_n), grid_f)

    # VMEM budget: double-buffered in + out blocks + resident params, with
    # headroom; never request more than ~48 MiB (v7x physical VMEM is 64 MiB).
    itemsize = jnp.dtype(x_flat.dtype).itemsize
    block_bytes = tile_n * tile_f * itemsize
    vmem_limit = int(min(max(4 * block_bytes + 2 * FEATURES * 4 + (1 << 20),
                             16 << 20),
                         48 << 20))

    out = pl.pallas_call(
        _bn_relu_kernel,
        out_shape=jax.ShapeDtypeStruct((n, FEATURES), x_flat.dtype),
        grid_spec=pltpu.PrefetchScalarGridSpec(
            num_scalar_prefetch=0,
            grid=grid,
            in_specs=[
                pl.BlockSpec((tile_n, tile_f), lambda i, j: (i, j)),  # activations
                pl.BlockSpec((2, tile_f), lambda i, j: (0, j)),       # resident params
            ],
            out_specs=pl.BlockSpec((tile_n, tile_f), lambda i, j: (i, j)),
        ),
        compiler_params=pltpu.CompilerParams(
            dimension_semantics=("parallel", "parallel"),  # megacore-shardable on v7x
            vmem_limit_bytes=vmem_limit),
    )(x_flat, params)

    return out  # (N, 1024); Dropout(p=0.25) is identity in eval mode.


def _reference(x_nchw, gamma, beta, running_mean, running_var):
    # PyTorch-style eval BatchNorm1d + ReLU on the flattened input.
    x = x_nchw.reshape(x_nchw.shape[0], -1).astype(jnp.float32)
    y = (x - running_mean) * jax.lax.rsqrt(running_var + BN_EPS) * gamma + beta
    return jnp.maximum(y, 0.0)


if __name__ == "__main__":
    key = jax.random.PRNGKey(0)
    k_x, k_g, k_b, k_m, k_v = jax.random.split(key, 5)

    # (N, C, H, W) = (2, 4, 16, 16)  ->  C*H*W = 1024 features
    x = jax.random.normal(k_x, (2, 4, 16, 16), dtype=jnp.float32)

    # Deterministic (non-trivial) BatchNorm1d(1024) parameters / running stats.
    gamma = 1.0 + 0.1 * jax.random.normal(k_g, (FEATURES,), dtype=jnp.float32)
    beta = 0.1 * jax.random.normal(k_b, (FEATURES,), dtype=jnp.float32)
    running_mean = 0.1 * jax.random.normal(k_m, (FEATURES,), dtype=jnp.float32)
    running_var = 0.5 + jax.random.uniform(k_v, (FEATURES,), dtype=jnp.float32)

    out = linear_features_forward(x, gamma, beta, running_mean, running_var)
    out = jax.block_until_ready(out)

    ref = _reference(x, gamma, beta, running_mean, running_var)
    assert out.shape == (2, FEATURES), out.shape
    # Folded scale/shift differs from the unfolded BN formula only by f32 rounding.
    assert jnp.allclose(out, ref, atol=1e-4, rtol=1e-5), "mismatch vs reference"

    print("KERNEL_OK")
</pallas_src>

<mosaic_0001>
module attributes {stable_mosaic.version = 11 : i64} {
  func.func @_bn_relu_kernel(%arg0: i32, %arg1: i32, %arg2: memref<2x512xf32, #tpu.memory_space<vmem>>, %arg3: memref<2x512xf32, #tpu.memory_space<vmem>>, %arg4: memref<2x512xf32, #tpu.memory_space<vmem>>) attributes {dimension_semantics = [#tpu.dimension_semantics<parallel>, #tpu.dimension_semantics<parallel>], iteration_bounds = array<i64: 1, 2>, scalar_prefetch = 0 : i64, scratch_operands = 0 : i64, tpu.core_type = #tpu.core_type<tc>, window_params = [{transform_indices = @transform_0, window_bounds = array<i64: 2, 512>}, {transform_indices = @transform_1, window_bounds = array<i64: 2, 512>}, {transform_indices = @transform_2, window_bounds = array<i64: 2, 512>}]} {
    %c0 = arith.constant 0 : index
    %c0_0 = arith.constant 0 : index
    %0 = vector.load %arg2[%c0, %c0_0] : memref<2x512xf32, #tpu.memory_space<vmem>>, vector<2x512xf32>
    %c0_1 = arith.constant 0 : index
    %c0_2 = arith.constant 0 : index
    %1 = vector.load %arg3[%c0_1, %c0_2] : memref<2x512xf32, #tpu.memory_space<vmem>>, vector<1x512xf32>
    %c1 = arith.constant 1 : index
    %c0_3 = arith.constant 0 : index
    %2 = vector.load %arg3[%c1, %c0_3] : memref<2x512xf32, #tpu.memory_space<vmem>>, vector<1x512xf32>
    %3 = vector.broadcast %1 : vector<1x512xf32> to vector<2x512xf32>
    %4 = arith.mulf %0, %3 : vector<2x512xf32>
    %5 = vector.broadcast %2 : vector<1x512xf32> to vector<2x512xf32>
    %6 = arith.addf %4, %5 : vector<2x512xf32>
    %cst = arith.constant 0.000000e+00 : f32
    %7 = vector.broadcast %cst : f32 to vector<2x512xf32>
    %8 = arith.maximumf %6, %7 : vector<2x512xf32>
    %c0_4 = arith.constant 0 : index
    %c0_5 = arith.constant 0 : index
    %9 = vector.load %arg4[%c0_4, %c0_5] : memref<2x512xf32, #tpu.memory_space<vmem>>, vector<2x512xf32>
    tpu.vector_store %arg4[%c0_4, %c0_5], %8 {strides = array<i32>} : memref<2x512xf32, #tpu.memory_space<vmem>>, vector<2x512xf32>,
    return
  }
  func.func @transform_0(%arg0: i32, %arg1: i32) -> (i32, i32) {
    %c0_i32 = arith.constant 0 : i32
    return %arg0, %arg1 : i32, i32
  }
  func.func @transform_1(%arg0: i32, %arg1: i32) -> (i32, i32) {
    %c0_i32 = arith.constant 0 : i32
    %c0_i32_0 = arith.constant 0 : i32
    return %c0_i32, %arg1 : i32, i32
  }
  func.func @transform_2(%arg0: i32, %arg1: i32) -> (i32, i32) {
    %c0_i32 = arith.constant 0 : i32
    return %arg0, %arg1 : i32, i32
  }
}

</mosaic_0001>

<bundles_post_ra>
// kernel: tpu_custom_call.1
= control target key start
LH: loop header
LB: loop body
LE: loop exit
PB: predicated region body
PF: predicated region fallthrough
CT: control target
= control target key end

     0   :  { %7 = vsyncpa [#allocation3], 0  ;;  %s772_s0 = inlined_call_operand.hbm [shape: f32[2,1024], index: 0, kind: input, shape index: {}]   ;;  %s773_s1 = inlined_call_operand.hbm [shape: f32[2,1024], index: 1, kind: input, shape index: {}]   ;;  %s774_s2 = inlined_call_operand.hbm [shape: f32[2,1024], index: 2, kind: output, shape index: {}]  }
   0x1   :  { %9 = vsyncpa [#allocation3 + $0x1], 0 }
   0x2   :  { %10 = vsyncpa [#allocation6], 0 }
   0x3   :  { %12 = vsyncpa [#allocation6 + $0x1], 0 }
   0x4   :  { %13 = vsyncpa [#allocation4], 0 }
   0x5   :  { %15 = vsyncpa [#allocation4 + $0x1], 0  ;;  %s637_s9 = smov 0   ;;  %s639_s10 = smov 0  }
   0x6   :  { %s641_s11 = smov 0   ;;  %s643_s12 = smov 0  }
   0x7   :  { %s645_s13 = smov 0   ;;  %s647_s14 = smov 0  }
   0x8 LB: > { %s384_s15 = sadd.s32 4294967295, %s620_s14   ;;  %s385_s16 = sadd.s32 4294967294, %s620_s14   ;;  %s620_s14 = sphi %s647_s14, %s21_s14   ;;  %s616_s13 = sphi %s645_s13, %s783_s13   ;;  %s612_s12 = sphi %s643_s12, %s782_s12   ;;  %s608_s11 = sphi %s641_s11, %s781_s11   ;;  %s604_s10 = sphi %s639_s10, %s780_s10   ;;  %s600_s9 = sphi %s637_s9, %s779_s9  }
   0x9   : > { %s30_s17 = sadd.s32 1, %s616_s13  ;;  %s42_s18 = sadd.s32 1, %s608_s11 }
   0xa   : > { %p31_p0 = scmp.ge.s32.totalorder %s30_s17, 2  ;;  %p49_p1 = scmp.ne.s32.totalorder %s608_s11, %s604_s10 }
   0xb   : > { %p50_p2 = scmp.eq.s32.totalorder %s620_s14, 0  ;;  %p55_p3 = scmp.ne.s32.totalorder %s604_s10, %s600_s9 }
   0xc   : > { %s785_s17 = smov (%p31_p0, %s30_s17), 0  ;;  %p56_p5 = scmp.eq.s32.totalorder %s384_s15, 0 }
   0xd   : > { %p678_p4 = por %p50_p2, %p49_p1  ;;  %s38_s20 = ssub.s32 %s616_s13, %s785_s17 }
   0xe   : > { %p107_p6 = scmp.eq.s32.totalorder %s384_s15, 1  ;;  %p40_p7 = scmp.eq.s32.totalorder %s38_s20, 0 }
   0xf   : > { %p684_p8 = por %p56_p5, %p55_p3  ;;  %p113_p10 = scmp.eq.s32.totalorder %s385_s16, 1 }
  0x10   : > { %p688_p9 = por %p107_p6, %p49_p1  ;;  %p387_p12 = scmp.ge.s32.totalorder %s620_s14, 2 }
  0x11   : > { %s693_s23 = scalar_select %p40_p7, %s608_s11, %s42_s18  }
  0x12   : > { %p695_p11 = por %p113_p10, %p55_p3  ;;  %p424_p13 = scmp.lt.s32.totalorder %s620_s14, 2 }
  0x13   : > { %s133_s25 = sand.u32 1, %s608_s11   ;;  %s404_s27 = sshll.u32 %s616_s13, 3 }
  0x14   : > { %s388_s26 = sshll.u32 %s133_s25, 3  ;;  %s144_s30 = scalar_lea.hbm %s772_s0, %s404_s27 }
  0x15   : > { %s137_s3 = scalar_lea.vmem [#allocation2], %s388_s26  ;;  %s146_s5 = sshll.u32 %s144_s30, 4  ;;  %s147_s5 = int_to_ptr.hbm [resolvable:$true] %s146_s5 }
  0x16   : > { %s148_s4 = sshll.u32 %s137_s3, 4  ;;  %p414_p0 = pnand %p424_p13, %p678_p4  ;;  %s149_s4 = int_to_ptr.vmem [resolvable:$true] %s148_s4 }
  0x17   : > { %p394_p1 = scmp.ge.s32.totalorder %s620_s14, 1  ;;  %p173_p2 = scmp.lt.s32.totalorder %s620_s14, 3 }
  0x18   : > { %s134_s6 = scalar_lea.sflag [#allocation3], %s133_s25  ;;  %s164_s15 = scalar_lea.hbm %s773_s1, %s404_s27 }
  0x19   : > { %416 = dma.hbm_to_vmem [thread:$0]  (!%p414_p0), %s147_s5, 128, %s149_s4, %s134_s6  }
  0x1a   : > { %p174_p3 = pnand %p394_p1, %p173_p2  ;;  %s159_s16 = scalar_lea.vmem [#allocation5], %s388_s26 }
  0x1b   : > { %s168_s18 = sshll.u32 %s159_s16, 4  ;;  %s166_s20 = sshll.u32 %s164_s15, 4  ;;  %s169_s18 = int_to_ptr.vmem [resolvable:$true] %s168_s18  ;;  %s167_s20 = int_to_ptr.hbm [resolvable:$true] %s166_s20 }
  0x1c   : > { %s156_s28 = scalar_lea.sflag [#allocation6], %s133_s25  ;;  %177 = sbr.rel (%p174_p3) target bundleno = 53 (0x35), region = 28 }
  0x1d   : > { %419 = dma.hbm_to_vmem [thread:$0]  (!%p414_p0), %s167_s20, 128, %s169_s18, %s156_s28  }
  0x1e   : > { %s714_s19 = sand.u32 (!%p174_p3), 1, %s604_s10  }
  0x1f   : > { %s717_s29 = sshll.u32 (!%p174_p3), %s714_s19, 3  ;;  %s180_s30 = scalar_lea.sflag (!%p174_p3), [#allocation3], %s714_s19 }
  0x20   : > { %s183_s3 = scalar_lea.vmem (!%p174_p3), [#allocation2], %s717_s29 }
  0x21   : > { %587 = dma.done.wait (%p684_p8), %s180_s30, 128  }
  0x22   : > { %589 = vsyncadd (%p684_p8), %s180_s30, 4294967168  ;;  %s190_s25 = scalar_lea.sflag [#allocation6], %s714_s19  ;;  %s193_s26 = scalar_lea.vmem [#allocation5], %s717_s29 }
  0x23   : > { %591 = dma.done.wait (%p684_p8), %s190_s25, 128  }
  0x24   : > { %593 = vsyncadd (%p684_p8), %s190_s25, 4294967168  ;;  %v224_v0 = vld [vmem:[%s193_s26] ss:$2 sm:$0xf]  ;;  %vm235_vm0 = vcmask 1041408   ;;  %vm237_vm1 = vcmask 1045508  }
  0x25   : > { %v398_v1 = vld [vmem:[%s193_s26 + $0x1] ss:$2 sm:$0xf]  ;;  %v228_v2 = vperm.slane %v224_v0, 0  ;;  %v229_v3 = vperm.slane %v224_v0, 1  ;;  %v230_v4 = vperm.slane %v224_v0, 2 }
  0x26   : > { %v231_v5 = vperm.slane %v224_v0, 3  ;;  %v244_v6 = vperm.slane %v398_v1, 0  ;;  %v245_v7 = vperm.slane %v398_v1, 1  ;;  %v246_v8 = vperm.slane %v398_v1, 2  ;;  %s406_s27 = sshll.u32 %s612_s12, 3  ;;  %v223_v15 = vld [vmem:[%s183_s3] sm:$0xff] }
  0x27   : > { %v232_v9 = vrot.slane %v229_v3, 6  ;;  %v233_v10 = vrot.slane %v230_v4, 4  ;;  %v247_v11 = vperm.slane %v398_v1, 3  ;;  %vm239_vm2 = vcmask 1043456   ;;  %s272_s5 = scalar_lea.hbm %s774_s2, %s406_s27  ;;  %s219_s12 = scalar_lea.vmem [#allocation7], %s717_s29 }
  0x28   : > { %v234_v12 = vrot.slane %v231_v5, 2  ;;  %v248_v13 = vrot.slane %v245_v7, 6  ;;  %v249_v14 = vrot.slane %v246_v8, 4  ;;  %s274_s6 = sshll.u32 %s219_s12, 4  ;;  %s276_s7 = sshll.u32 %s272_s5, 4  ;;  %s275_s6 = int_to_ptr.vmem [resolvable:$true] %s274_s6  ;;  %s277_s7 = int_to_ptr.hbm [resolvable:$true] %s276_s7 }
  0x29   : > { %v236_v16 = vsel %vm235_vm0, %v228_v2, %v232_v9  ;;  %v250_v17 = vrot.slane %v247_v11, 2  ;;  %s259_s8 = scalar_lea.sflag [#allocation4], %s714_s19  ;;  %s548_s15 = sshra.s32 %s277_s7, 4  ;;  %s549_s15 = int_to_ptr.hbm [resolvable:$true] %s548_s15 }
  0x2a   : > { %v238_v18 = vsel %vm237_vm1, %v233_v10, %v234_v12  ;;  %v251_v19 = vsel %vm235_vm0, %v244_v6, %v248_v13  ;;  %s550_s16 = scalar_lea.hbm %s549_s15, 8  ;;  %s554_s28 = scalar_lea.hbm %s774_s2, 16 }
  0x2b   : > { %v240_v20 = vsel %vm239_vm2, %v236_v16, %v238_v18  ;;  %v252_v21 = vsel %vm237_vm1, %v249_v14, %v250_v17  ;;  %p551_p4 = scmp.ne.s32.totalorder %s549_s15, %s550_s16  ;;  %p555_p7 = scmp.lt.s32.totalorder %s549_s15, %s774_s2 }
  0x2c   : > { %v242_v22 = vmul.f32 %v240_v20, %v223_v15  ;;  %v253_v23 = vsel %vm239_vm2, %v251_v19, %v252_v21  ;;  %p556_p8 = scmp.lt.s32.totalorder %s554_s28, %s550_s16 }
  0x2d   : > { %p552_p5 = pnand %p551_p4, %p688_p9 }
  0x2e   : > { %v255_v24 = vadd.f32 %v253_v23, %v242_v22  ;;  %p557_p10 = por %p556_p8, %p555_p7 }
  0x2f   : > { %p553_p6 = pneg %p552_p5 }
  0x30   : > { %v256_v25 = vmax.f32 %v255_v24, 0.0 }
  0x31   : > { %p558_p13 = pnand %p557_p10, %p553_p6 }
  0x32   : > { %257 = vst [vmem:[%s219_s12] sm:$0xff] %v256_v25 }
  0x33   : > { %561 = shalt.err (!%p558_p13)
}
  0x34   : > { %411 = dma.vmem_to_hbm [thread:$0]  (%p688_p9), %s275_s6, 128, %s277_s7, %s259_s8  }
  0x35 PF: > { %s288_s19 = sand.u32 1, %s600_s9   ;;  %p421_p0 = pnand %p387_p12, %p695_p11 }
  0x36   : > { %s289_s3 = scalar_lea.sflag [#allocation4], %s288_s19 }
  0x37   : > { %p422_p1 = pneg %p421_p0 }
  0x39   : > { %595 = dma.done.wait (%p422_p1), %s289_s3, 128  }
  0x3a   : > { %597 = vsyncadd (%p422_p1), %s289_s3, 4294967168  ;;  %s21_s14 = sadd.s32 1, %s620_s14   ;;  %s779_s9 = smov %s604_s10 }
  0x3b   : > { %p18_p2 = scmp.ge.s32.totalorder %s21_s14, 4   ;;  %s780_s10 = smov %s608_s11 }
  0x3c   : > { %s781_s11 = smov %s693_s23  ;;  %s782_s12 = smov %s616_s13 }
  0x3d   : > { %s783_s13 = smov %s785_s17  ;;  %20 = sbr.rel (!%p18_p2) target bundleno = 8 (0x8), region = 87 }
  0x42   :  { %295 = vsyncpa [#allocation3], 1 }
  0x43   :  { %297 = vsyncpa [#allocation3 + $0x1], 1 }
  0x44   :  { %298 = vsyncpa [#allocation6], 1 }
  0x45   :  { %300 = vsyncpa [#allocation6 + $0x1], 1 }
  0x46   :  { %301 = vsyncpa [#allocation4], 1 }
  0x47   :  { %303 = vsyncpa [#allocation4 + $0x1], 1 }

</bundles_post_ra>
